<compile_context>
chip_gen: v7x
topology: tpu7x:2x2x1
jax: 0.10.0
libtpu: 0.0.40
codegen_flags: <defaults>
</compile_context>

<pallas_src>
import jax
import jax.numpy as jnp
from jax.experimental import pallas as pl
from jax.experimental.pallas import tpu as pltpu


def _hbm_copy_kernel(w_hbm, o_hbm, sem):
    # Single direct HBM->HBM DMA of the whole parameter buffer.
    cp = pltpu.make_async_copy(w_hbm, o_hbm, sem)
    cp.start()
    cp.wait()


def _materialize_copy(weight: jax.Array) -> jax.Array:
    """Bit-exact copy of `weight` into a fresh buffer via one HBM->HBM DMA."""
    total_bytes = int(weight.size) * weight.dtype.itemsize
    return pl.pallas_call(
        _hbm_copy_kernel,
        out_shape=jax.ShapeDtypeStruct(weight.shape, weight.dtype),
        in_specs=[pl.BlockSpec(memory_space=pl.ANY)],
        out_specs=pl.BlockSpec(memory_space=pl.ANY),
        scratch_shapes=[pltpu.SemaphoreType.DMA],
        cost_estimate=pl.CostEstimate(
            flops=0, transcendentals=0, bytes_accessed=2 * total_bytes
        ),
    )(weight)


def synthesized_image_forward(weight: jax.Array, copy: bool = False) -> jax.Array:
    """Pallas implementation of SynthesizedImage.forward().

    weight: the parameter tensor (any shape / dtype).
    copy:   False (default) -> zero-cost identity, exactly matching the module's
            forward() semantics (returns the parameter itself).
            True  -> materialize a decoupled copy with a single HBM->HBM DMA
            (useful only if the caller must not alias the parameter buffer).
    """
    if not copy:
        # forward(): return self.weight  — identity; no kernel, no HBM traffic.
        return weight

    # Degenerate cases (empty tensor, 0-d scalar): nothing worth DMA-ing.
    if weight.size == 0 or weight.ndim == 0:
        return weight

    return _materialize_copy(weight)


if __name__ == "__main__":
    # Deterministic parameter init mirroring nn.Parameter(torch.rand(*shape)):
    # uniform values in [0, 1).  Small image-like NCHW shape.
    shape = (2, 4, 16, 16)
    key = jax.random.PRNGKey(0)
    weight = jax.random.uniform(key, shape, dtype=jnp.float32)

    # Fast path — the module's actual forward (kernel elided, per perf review).
    out_fast = jax.block_until_ready(synthesized_image_forward(weight))

    # Copy path — exercise the Pallas HBM->HBM DMA kernel once.
    out_copy = jax.block_until_ready(synthesized_image_forward(weight, copy=True))

    # Sanity checks: forward() must return the parameter exactly.
    assert out_fast.shape == weight.shape and out_fast.dtype == weight.dtype
    assert out_copy.shape == weight.shape and out_copy.dtype == weight.dtype
    assert bool(jnp.all(out_fast == weight))
    assert bool(jnp.all(out_copy == weight))

    print("KERNEL_OK")
</pallas_src>

<mosaic_0001>
module attributes {stable_mosaic.version = 11 : i64} {
  func.func @_hbm_copy_kernel(%arg0: memref<2x4x16x16xf32, #tpu.memory_space<any>>, %arg1: memref<2x4x16x16xf32, #tpu.memory_space<any>>, %arg2: memref<!tpu.dma_semaphore, #tpu.memory_space<semaphore_mem>>) attributes {dimension_semantics = [], scalar_prefetch = 0 : i64, scratch_operands = 1 : i64, tpu.core_type = #tpu.core_type<tc>} {
    tpu.enqueue_dma source(%arg0 : memref<2x4x16x16xf32, #tpu.memory_space<any>>) target(%arg1 : memref<2x4x16x16xf32, #tpu.memory_space<any>>) target_semaphore(%arg2 : memref<!tpu.dma_semaphore, #tpu.memory_space<semaphore_mem>>)
    tpu.wait_dma2 semaphore(%arg2 : memref<!tpu.dma_semaphore, #tpu.memory_space<semaphore_mem>>) src(%arg0 : memref<2x4x16x16xf32, #tpu.memory_space<any>>) dst(%arg1 : memref<2x4x16x16xf32, #tpu.memory_space<any>>)
    return
  }
}

</mosaic_0001>

<bundles_post_ra>
// kernel: tpu_custom_call.1
= control target key start
LH: loop header
LB: loop body
LE: loop exit
PB: predicated region body
PF: predicated region fallthrough
CT: control target
= control target key end

     0   :  { %s36_s6 = smov [#allocation2]   ;;  %s37_s7 = smov [#allocation3]   ;;  %s55_s0 = inlined_call_operand.hbm [shape: f32[2,4,16,16], index: 0, kind: input, shape index: {}]   ;;  %s56_s1 = inlined_call_operand.hbm [shape: f32[2,4,16,16], index: 1, kind: output, shape index: {}]  }
   0x1   :  { %s38_s8 = smov 0  }
   0x2   :  { %18 = dma.general %s55_s0, 2048, %s56_s1, %s36_s6, %s37_s7, [#allocation4], %s38_s8, 0  }
   0x3   :  { %34 = dma.done.wait [#allocation2], 2048 }
   0x4   :  { %35 = vsyncadd [#allocation2], 4294965248 }
   0x5   :  { %24 = vsyncmov [#allocation2] }
   0x8   :  { %s25_s13 = vpop.sfrf %24 }
   0x9   :  { %p30_p0 = scmp.ne.s32.totalorder %s25_s13, 0 }
   0xb   :  { %29 = shalt.err (%p30_p0)  }

</bundles_post_ra>
